<compile_context>
chip_gen: v6e
topology: v6e:2x2x1
jax: 0.10.0
libtpu: 0.0.40
codegen_flags: <defaults>
</compile_context>

<pallas_src>
import functools

import jax
import jax.numpy as jnp
from jax.experimental import pallas as pl
from jax.experimental.pallas import tpu as pltpu


def block_kernel(x_ref, mask_ref, w_ref, b_ref, gavg_ref, gs_ref, bs_ref, o_ref,
                 *, l_valid: int):
    """One grid step = one batch element.

    x_ref:    (1, C_in, Lp)       zero-padded input (Lp multiple of 128, pad >= 1)
    mask_ref: (1, 1, Lp)          user mask, zero in the padded tail
    w_ref:    (3, C_out, C_in)    standardized conv weight, tap k applies to x[l + k - 1]
    b_ref:    (C_out, 1)          conv bias
    gavg_ref: (C_out, C_out)      group-averaging matrix: (same-group indicator)/(cg*L)
    gs_ref:   (1, C_out, 1)       gamma * (scale + 1)         (per batch)
    bs_ref:   (1, C_out, 1)       beta * (scale + 1) + shift  (per batch)
    o_ref:    (1, C_out, Lp)
    """
    x = x_ref[0]            # [C_in, Lp]
    m = mask_ref[0]         # [1, Lp]
    bias = b_ref[...]       # [C_out, 1]
    gavg = gavg_ref[...]    # [C_out, C_out]
    gs = gs_ref[0]          # [C_out, 1]
    bs = bs_ref[0]          # [C_out, 1]

    lp = x.shape[-1]

    # ---- masked input + shifted conv operands ------------------------------------
    # Wrapper guarantees >= 1 zero pad lane at the tail, so no boundary masks needed:
    #   x_left wrap lane 0  <- xm[:, Lp-1] == 0 (padded tail)        -> correct conv pad
    #   x_right wrap lane Lp-1 <- xm[:, 0]  (contaminated)           -> invalid pad lane,
    #   excluded from stats by vmask and zeroed by the output mask.
    xm = x * m                                  # [C_in, Lp]
    x_left = jnp.roll(xm, 1, axis=1)            # x_left[:, l]  = xm[:, l-1]
    x_right = jnp.roll(xm, -1, axis=1)          # x_right[:, l] = xm[:, l+1]

    # ---- conv1d (kernel=3, padding=1) as three accumulated MXU matmuls ------------
    conv = jnp.dot(w_ref[1], xm, preferred_element_type=jnp.float32)       # center tap
    conv = conv + jnp.dot(w_ref[0], x_left, preferred_element_type=jnp.float32)
    conv = conv + jnp.dot(w_ref[2], x_right, preferred_element_type=jnp.float32)
    # conv: [C_out, Lp], no bias yet (bias folded analytically into the stats below)

    # ---- GroupNorm statistics over the valid length -------------------------------
    lane = jax.lax.broadcasted_iota(jnp.int32, (1, lp), 1)
    vmask = (lane < l_valid).astype(jnp.float32)            # [1, Lp]
    cm = conv * vmask
    s = jnp.sum(cm, axis=-1, keepdims=True)                  # [C_out, 1]  sum(conv)
    sq = jnp.sum(cm * conv, axis=-1, keepdims=True)          # [C_out, 1]  sum(conv^2)

    lo = jnp.float32(l_valid)
    s_y = s + lo * bias                                      # stats of y = conv + bias
    sq_y = sq + 2.0 * bias * s + lo * bias * bias

    # group mean / E[y^2] per channel via one precomputed pooling matmul each
    mean_c = jnp.dot(gavg, s_y, preferred_element_type=jnp.float32)   # [C_out, 1]
    esq_c = jnp.dot(gavg, sq_y, preferred_element_type=jnp.float32)   # [C_out, 1]
    var_c = esq_c - mean_c * mean_c                           # biased variance (GroupNorm)
    inv_c = jax.lax.rsqrt(var_c + jnp.float32(1e-5))

    # ---- fold normalize + GroupNorm affine + scale_shift into a single FMA --------
    a = inv_c * gs                                            # [C_out, 1]
    b2 = (bias - mean_c) * a + bs                             # [C_out, 1]
    z = conv * a + b2                                         # [C_out, Lp]

    # ---- SiLU then output mask -----------------------------------------------------
    o_ref[0] = (z * jax.nn.sigmoid(z) * m).astype(o_ref.dtype)


def block_forward(x, mask, weight, bias, gamma, beta, scale, shift, *, groups=8):
    B, c_in, L = x.shape
    c_out, _, k = weight.shape
    assert k == 3 and c_out % groups == 0
    cg = c_out // groups

    # ---- weight standardization (batch-invariant -> hoisted out of the kernel) ----
    # torch: mean over dims [1,2], std with Bessel correction, normalize by (std + eps)
    eps_w = 1e-5 if x.dtype == jnp.float32 else 1e-3
    n = c_in * k
    w_mean = weight.mean(axis=(1, 2), keepdims=True)
    w_std = jnp.sqrt(jnp.sum((weight - w_mean) ** 2, axis=(1, 2), keepdims=True) / (n - 1))
    wn = (weight - w_mean) / (w_std + eps_w)
    w_taps = jnp.transpose(wn, (2, 0, 1)).astype(jnp.float32)   # [3, C_out, C_in]

    # ---- pad L to a multiple of 128 AND guarantee >= 1 zero pad lane ---------------
    L_pad = ((L + 128) // 128) * 128        # round_up(L + 1, 128)  ->  pad >= 1 always
    pad = L_pad - L
    x_p = jnp.pad(x, ((0, 0), (0, 0), (0, pad)))
    m_p = jnp.pad(mask, ((0, 0), (0, 0), (0, pad)))

    # ---- group-averaging matrix (replaces sublane reshapes in the kernel) ----------
    gid = jnp.arange(c_out) // cg
    gavg = (gid[:, None] == gid[None, :]).astype(jnp.float32) / float(cg * L)

    # ---- fold GroupNorm affine with scale_shift (per batch, per channel) -----------
    bias2 = bias.reshape(c_out, 1).astype(jnp.float32)
    gscaled = (gamma.reshape(1, c_out, 1) * (scale + 1.0)).astype(jnp.float32)
    bscaled = (beta.reshape(1, c_out, 1) * (scale + 1.0) + shift).astype(jnp.float32)

    # ---- scoped-VMEM limit: raise (never lower) based on per-batch working set -----
    est = 4 * L_pad * (4 * c_in + 8 * c_out) + 4 * (3 * c_out * c_in + c_out * c_out)
    vmem_limit = int(min(max(32 << 20, 2 * est), 100 << 20))

    kernel = functools.partial(block_kernel, l_valid=L)
    out_p = pl.pallas_call(
        kernel,
        out_shape=jax.ShapeDtypeStruct((B, c_out, L_pad), x.dtype),
        grid=(B,),
        in_specs=[
            pl.BlockSpec((1, c_in, L_pad), lambda b: (b, 0, 0)),      # x (padded)
            pl.BlockSpec((1, 1, L_pad), lambda b: (b, 0, 0)),         # mask (padded)
            pl.BlockSpec((3, c_out, c_in), lambda b: (0, 0, 0)),      # standardized weight taps
            pl.BlockSpec((c_out, 1), lambda b: (0, 0)),               # conv bias
            pl.BlockSpec((c_out, c_out), lambda b: (0, 0)),           # group-averaging matrix
            pl.BlockSpec((1, c_out, 1), lambda b: (b, 0, 0)),         # gamma*(scale+1)
            pl.BlockSpec((1, c_out, 1), lambda b: (b, 0, 0)),         # beta*(scale+1)+shift
        ],
        out_specs=pl.BlockSpec((1, c_out, L_pad), lambda b: (b, 0, 0)),
        compiler_params=pltpu.CompilerParams(
            dimension_semantics=("parallel",),
            vmem_limit_bytes=vmem_limit),
    )(x_p, m_p, w_taps, bias2, gavg, gscaled, bscaled)
    return out_p[:, :, :L]


def block_forward_ref(x, mask, weight, bias, gamma, beta, scale, shift, *, groups=8):
    """Pure-JAX reference (mirrors the PyTorch module)."""
    eps_w = 1e-5
    n = weight.shape[1] * weight.shape[2]
    w_mean = weight.mean(axis=(1, 2), keepdims=True)
    w_std = jnp.sqrt(jnp.sum((weight - w_mean) ** 2, axis=(1, 2), keepdims=True) / (n - 1))
    wn = (weight - w_mean) / (w_std + eps_w)
    xm = x * mask
    y = jax.lax.conv_general_dilated(
        xm, wn, window_strides=(1,), padding=((1, 1),),
        dimension_numbers=("NCH", "OIH", "NCH"))
    y = y + bias.reshape(1, -1, 1)
    B, C, L = y.shape
    yg = y.reshape(B, groups, C // groups, L)
    gm = yg.mean(axis=(2, 3), keepdims=True)
    gv = ((yg - gm) ** 2).mean(axis=(2, 3), keepdims=True)
    y = ((yg - gm) / jnp.sqrt(gv + 1e-5)).reshape(B, C, L)
    y = y * gamma.reshape(1, -1, 1) + beta.reshape(1, -1, 1)
    y = y * (scale + 1.0) + shift
    y = y * jax.nn.sigmoid(y)
    return y * mask


if __name__ == "__main__":
    # Small shapes consistent with Block(dim=4, dim_out=16, groups=8)
    B, C_IN, C_OUT, L, GROUPS = 2, 4, 16, 16, 8

    key = jax.random.PRNGKey(0)
    kx, kw, kb, kg, kbeta, ks, ksh = jax.random.split(key, 7)

    x = jax.random.normal(kx, (B, C_IN, L), dtype=jnp.float32)

    # mask: [B, 1, L], second sequence has trailing padding
    mask = jnp.ones((B, 1, L), dtype=jnp.float32)
    mask = mask.at[1, 0, 12:].set(0.0)

    # parameters (deterministic synthetic init)
    weight = jax.random.normal(kw, (C_OUT, C_IN, 3), dtype=jnp.float32) * 0.2
    bias = jax.random.normal(kb, (C_OUT,), dtype=jnp.float32) * 0.1
    gamma = 1.0 + 0.1 * jax.random.normal(kg, (C_OUT,), dtype=jnp.float32)
    beta = 0.1 * jax.random.normal(kbeta, (C_OUT,), dtype=jnp.float32)

    # scale_shift (as produced per-batch by the surrounding ResnetBlock's time MLP)
    scale = 0.1 * jax.random.normal(ks, (B, C_OUT, 1), dtype=jnp.float32)
    shift = 0.1 * jax.random.normal(ksh, (B, C_OUT, 1), dtype=jnp.float32)

    out = block_forward(x, mask, weight, bias, gamma, beta, scale, shift, groups=GROUPS)
    out = jax.block_until_ready(out)

    ref = block_forward_ref(x, mask, weight, bias, gamma, beta, scale, shift, groups=GROUPS)
    assert out.shape == (B, C_OUT, L)
    assert jnp.allclose(out, ref, atol=2e-4, rtol=2e-4), "Pallas output mismatch vs reference"

    print("KERNEL_OK")
</pallas_src>

<mosaic_0001>
module attributes {stable_mosaic.version = 11 : i64} {
  func.func @block_kernel(%arg0: i32, %arg1: memref<1x4x128xf32, #tpu.memory_space<vmem>>, %arg2: memref<1x1x128xf32, #tpu.memory_space<vmem>>, %arg3: memref<3x16x4xf32, #tpu.memory_space<vmem>>, %arg4: memref<16x1xf32, #tpu.memory_space<vmem>>, %arg5: memref<16x16xf32, #tpu.memory_space<vmem>>, %arg6: memref<1x16x1xf32, #tpu.memory_space<vmem>>, %arg7: memref<1x16x1xf32, #tpu.memory_space<vmem>>, %arg8: memref<1x16x128xf32, #tpu.memory_space<vmem>>) attributes {dimension_semantics = [#tpu.dimension_semantics<parallel>], iteration_bounds = array<i64: 2>, scalar_prefetch = 0 : i64, scratch_operands = 0 : i64, tpu.core_type = #tpu.core_type<tc>, window_params = [{transform_indices = @transform_0, window_bounds = array<i64: 1, 4, 128>}, {transform_indices = @transform_1, window_bounds = array<i64: 1, 1, 128>}, {pipeline_mode = #tpu.pipeline_mode<synchronous>, transform_indices = @transform_2, window_bounds = array<i64: 3, 16, 4>}, {pipeline_mode = #tpu.pipeline_mode<synchronous>, transform_indices = @transform_3, window_bounds = array<i64: 16, 1>}, {pipeline_mode = #tpu.pipeline_mode<synchronous>, transform_indices = @transform_4, window_bounds = array<i64: 16, 16>}, {transform_indices = @transform_5, window_bounds = array<i64: 1, 16, 1>}, {transform_indices = @transform_6, window_bounds = array<i64: 1, 16, 1>}, {transform_indices = @transform_7, window_bounds = array<i64: 1, 16, 128>}]} {
    %c0 = arith.constant 0 : index
    %c0_0 = arith.constant 0 : index
    %c0_1 = arith.constant 0 : index
    %0 = vector.load %arg1[%c0, %c0_0, %c0_1] : memref<1x4x128xf32, #tpu.memory_space<vmem>>, vector<1x4x128xf32>
    %1 = vector.shape_cast %0 : vector<1x4x128xf32> to vector<4x128xf32>
    %c0_2 = arith.constant 0 : index
    %c0_3 = arith.constant 0 : index
    %c0_4 = arith.constant 0 : index
    %2 = vector.load %arg2[%c0_2, %c0_3, %c0_4] : memref<1x1x128xf32, #tpu.memory_space<vmem>>, vector<1x1x128xf32>
    %3 = vector.shape_cast %2 : vector<1x1x128xf32> to vector<1x128xf32>
    %c0_5 = arith.constant 0 : index
    %c0_6 = arith.constant 0 : index
    %4 = vector.load %arg4[%c0_5, %c0_6] : memref<16x1xf32, #tpu.memory_space<vmem>>, vector<16x1xf32>
    %c0_7 = arith.constant 0 : index
    %c0_8 = arith.constant 0 : index
    %5 = vector.load %arg5[%c0_7, %c0_8] : memref<16x16xf32, #tpu.memory_space<vmem>>, vector<16x16xf32>
    %c0_9 = arith.constant 0 : index
    %c0_10 = arith.constant 0 : index
    %c0_11 = arith.constant 0 : index
    %6 = vector.load %arg6[%c0_9, %c0_10, %c0_11] : memref<1x16x1xf32, #tpu.memory_space<vmem>>, vector<1x16x1xf32>
    %7 = vector.shape_cast %6 : vector<1x16x1xf32> to vector<16x1xf32>
    %c0_12 = arith.constant 0 : index
    %c0_13 = arith.constant 0 : index
    %c0_14 = arith.constant 0 : index
    %8 = vector.load %arg7[%c0_12, %c0_13, %c0_14] : memref<1x16x1xf32, #tpu.memory_space<vmem>>, vector<1x16x1xf32>
    %9 = vector.shape_cast %8 : vector<1x16x1xf32> to vector<16x1xf32>
    %10 = vector.broadcast %3 : vector<1x128xf32> to vector<4x128xf32>
    %11 = arith.mulf %1, %10 : vector<4x128xf32>
    %12 = vector.extract_strided_slice %11 {offsets = [0, 127], sizes = [4, 1], strides = [1, 1]} : vector<4x128xf32> to vector<4x1xf32>
    %13 = vector.extract_strided_slice %11 {offsets = [0, 0], sizes = [4, 127], strides = [1, 1]} : vector<4x128xf32> to vector<4x127xf32>
    %14 = tpu.concatenate %12, %13 in 1 : vector<4x1xf32>, vector<4x127xf32> -> vector<4x128xf32>
    %15 = vector.extract_strided_slice %11 {offsets = [0, 1], sizes = [4, 127], strides = [1, 1]} : vector<4x128xf32> to vector<4x127xf32>
    %16 = vector.extract_strided_slice %11 {offsets = [0, 0], sizes = [4, 1], strides = [1, 1]} : vector<4x128xf32> to vector<4x1xf32>
    %17 = tpu.concatenate %15, %16 in 1 : vector<4x127xf32>, vector<4x1xf32> -> vector<4x128xf32>
    %c1 = arith.constant 1 : index
    %c0_15 = arith.constant 0 : index
    %c0_16 = arith.constant 0 : index
    %18 = vector.load %arg3[%c1, %c0_15, %c0_16] : memref<3x16x4xf32, #tpu.memory_space<vmem>>, vector<1x16x4xf32>
    %19 = vector.shape_cast %18 : vector<1x16x4xf32> to vector<16x4xf32>
    %cst = arith.constant dense<0.000000e+00> : vector<16x128xf32>
    %20 = tpu.matmul %19, %11, %cst {dimension_numbers = #tpu.dot_dimension_numbers<[1], [0], [0], [1], [0, 0, 1, 1], [], []>} : vector<16x4xf32>, vector<4x128xf32>, vector<16x128xf32> -> vector<16x128xf32>
    %c0_17 = arith.constant 0 : index
    %c0_18 = arith.constant 0 : index
    %c0_19 = arith.constant 0 : index
    %21 = vector.load %arg3[%c0_17, %c0_18, %c0_19] : memref<3x16x4xf32, #tpu.memory_space<vmem>>, vector<1x16x4xf32>
    %22 = vector.shape_cast %21 : vector<1x16x4xf32> to vector<16x4xf32>
    %cst_20 = arith.constant dense<0.000000e+00> : vector<16x128xf32>
    %23 = tpu.matmul %22, %14, %cst_20 {dimension_numbers = #tpu.dot_dimension_numbers<[1], [0], [0], [1], [0, 0, 1, 1], [], []>} : vector<16x4xf32>, vector<4x128xf32>, vector<16x128xf32> -> vector<16x128xf32>
    %24 = arith.addf %20, %23 : vector<16x128xf32>
    %c2 = arith.constant 2 : index
    %c0_21 = arith.constant 0 : index
    %c0_22 = arith.constant 0 : index
    %25 = vector.load %arg3[%c2, %c0_21, %c0_22] : memref<3x16x4xf32, #tpu.memory_space<vmem>>, vector<1x16x4xf32>
    %26 = vector.shape_cast %25 : vector<1x16x4xf32> to vector<16x4xf32>
    %cst_23 = arith.constant dense<0.000000e+00> : vector<16x128xf32>
    %27 = tpu.matmul %26, %17, %cst_23 {dimension_numbers = #tpu.dot_dimension_numbers<[1], [0], [0], [1], [0, 0, 1, 1], [], []>} : vector<16x4xf32>, vector<4x128xf32>, vector<16x128xf32> -> vector<16x128xf32>
    %28 = arith.addf %24, %27 : vector<16x128xf32>
    %29 = tpu.iota {dimensions = array<i32: 1>} : vector<1x128xi32>
    %c16_i32 = arith.constant 16 : i32
    %30 = vector.broadcast %c16_i32 : i32 to vector<1x128xi32>
    %31 = arith.cmpi slt, %29, %30 : vector<1x128xi32>
    %32 = arith.extui %31 : vector<1x128xi1> to vector<1x128xi32>
    %33 = arith.sitofp %32 : vector<1x128xi32> to vector<1x128xf32>
    %34 = vector.broadcast %33 : vector<1x128xf32> to vector<16x128xf32>
    %35 = arith.mulf %28, %34 : vector<16x128xf32>
    %cst_24 = arith.constant dense<0.000000e+00> : vector<16xf32>
    %36 = vector.multi_reduction <add>, %35, %cst_24 [1] : vector<16x128xf32> to vector<16xf32>
    %37 = vector.shape_cast %36 : vector<16xf32> to vector<16x1xf32>
    %38 = arith.mulf %35, %28 : vector<16x128xf32>
    %cst_25 = arith.constant dense<0.000000e+00> : vector<16xf32>
    %39 = vector.multi_reduction <add>, %38, %cst_25 [1] : vector<16x128xf32> to vector<16xf32>
    %40 = vector.shape_cast %39 : vector<16xf32> to vector<16x1xf32>
    %cst_26 = arith.constant 1.600000e+01 : f32
    %41 = vector.broadcast %cst_26 : f32 to vector<16x1xf32>
    %42 = arith.mulf %41, %4 : vector<16x1xf32>
    %43 = arith.addf %37, %42 : vector<16x1xf32>
    %cst_27 = arith.constant 2.000000e+00 : f32
    %44 = vector.broadcast %cst_27 : f32 to vector<16x1xf32>
    %45 = arith.mulf %44, %4 : vector<16x1xf32>
    %46 = arith.mulf %45, %37 : vector<16x1xf32>
    %47 = arith.addf %40, %46 : vector<16x1xf32>
    %cst_28 = arith.constant 1.600000e+01 : f32
    %48 = vector.broadcast %cst_28 : f32 to vector<16x1xf32>
    %49 = arith.mulf %48, %4 : vector<16x1xf32>
    %50 = arith.mulf %49, %4 : vector<16x1xf32>
    %51 = arith.addf %47, %50 : vector<16x1xf32>
    %cst_29 = arith.constant dense<0.000000e+00> : vector<16x1xf32>
    %52 = tpu.matmul %5, %43, %cst_29 {dimension_numbers = #tpu.dot_dimension_numbers<[1], [0], [0], [1], [0, 0, 1, 1], [], []>} : vector<16x16xf32>, vector<16x1xf32>, vector<16x1xf32> -> vector<16x1xf32>
    %cst_30 = arith.constant dense<0.000000e+00> : vector<16x1xf32>
    %53 = tpu.matmul %5, %51, %cst_30 {dimension_numbers = #tpu.dot_dimension_numbers<[1], [0], [0], [1], [0, 0, 1, 1], [], []>} : vector<16x16xf32>, vector<16x1xf32>, vector<16x1xf32> -> vector<16x1xf32>
    %54 = arith.mulf %52, %52 : vector<16x1xf32>
    %55 = arith.subf %53, %54 : vector<16x1xf32>
    %cst_31 = arith.constant 9.99999974E-6 : f32
    %56 = vector.broadcast %cst_31 : f32 to vector<16x1xf32>
    %57 = arith.addf %55, %56 : vector<16x1xf32>
    %58 = math.rsqrt %57 : vector<16x1xf32>
    %59 = arith.mulf %58, %7 : vector<16x1xf32>
    %60 = arith.subf %4, %52 : vector<16x1xf32>
    %61 = arith.mulf %60, %59 : vector<16x1xf32>
    %62 = arith.addf %61, %9 : vector<16x1xf32>
    %63 = vector.broadcast %59 : vector<16x1xf32> to vector<16x128xf32>
    %64 = arith.mulf %28, %63 : vector<16x128xf32>
    %65 = vector.broadcast %62 : vector<16x1xf32> to vector<16x128xf32>
    %66 = arith.addf %64, %65 : vector<16x128xf32>
    %67 = arith.negf %66 : vector<16x128xf32>
    %68 = math.exp %67 : vector<16x128xf32>
    %cst_32 = arith.constant 1.000000e+00 : f32
    %69 = vector.broadcast %cst_32 : f32 to vector<16x128xf32>
    %70 = arith.addf %69, %68 : vector<16x128xf32>
    %71 = arith.divf %69, %70 : vector<16x128xf32>
    %72 = arith.mulf %66, %71 : vector<16x128xf32>
    %73 = vector.broadcast %3 : vector<1x128xf32> to vector<16x128xf32>
    %74 = arith.mulf %72, %73 : vector<16x128xf32>
    %c0_33 = arith.constant 0 : index
    %c0_34 = arith.constant 0 : index
    %c0_35 = arith.constant 0 : index
    %75 = vector.load %arg8[%c0_33, %c0_34, %c0_35] : memref<1x16x128xf32, #tpu.memory_space<vmem>>, vector<1x16x128xf32>
    %76 = vector.shape_cast %75 : vector<1x16x128xf32> to vector<16x128xf32>
    %77 = vector.shape_cast %74 : vector<16x128xf32> to vector<1x16x128xf32>
    tpu.vector_store %arg8[%c0_33, %c0_34, %c0_35], %77 {strides = array<i32>} : memref<1x16x128xf32, #tpu.memory_space<vmem>>, vector<1x16x128xf32>,
    return
  }
  func.func @transform_0(%arg0: i32) -> (i32, i32, i32) {
    %c0_i32 = arith.constant 0 : i32
    %c0_i32_0 = arith.constant 0 : i32
    %c0_i32_1 = arith.constant 0 : i32
    return %arg0, %c0_i32, %c0_i32_0 : i32, i32, i32
  }
  func.func @transform_1(%arg0: i32) -> (i32, i32, i32) {
    %c0_i32 = arith.constant 0 : i32
    %c0_i32_0 = arith.constant 0 : i32
    %c0_i32_1 = arith.constant 0 : i32
    return %arg0, %c0_i32, %c0_i32_0 : i32, i32, i32
  }
  func.func @transform_2(%arg0: i32) -> (i32, i32, i32) {
    %c0_i32 = arith.constant 0 : i32
    %c0_i32_0 = arith.constant 0 : i32
    %c0_i32_1 = arith.constant 0 : i32
    %c0_i32_2 = arith.constant 0 : i32
    return %c0_i32, %c0_i32_0, %c0_i32_1 : i32, i32, i32
  }
  func.func @transform_3(%arg0: i32) -> (i32, i32) {
    %c0_i32 = arith.constant 0 : i32
    %c0_i32_0 = arith.constant 0 : i32
    %c0_i32_1 = arith.constant 0 : i32
    return %c0_i32, %c0_i32_0 : i32, i32
  }
  func.func @transform_4(%arg0: i32) -> (i32, i32) {
    %c0_i32 = arith.constant 0 : i32
    %c0_i32_0 = arith.constant 0 : i32
    %c0_i32_1 = arith.constant 0 : i32
    return %c0_i32, %c0_i32_0 : i32, i32
  }
  func.func @transform_5(%arg0: i32) -> (i32, i32, i32) {
    %c0_i32 = arith.constant 0 : i32
    %c0_i32_0 = arith.constant 0 : i32
    %c0_i32_1 = arith.constant 0 : i32
    return %arg0, %c0_i32, %c0_i32_0 : i32, i32, i32
  }
  func.func @transform_6(%arg0: i32) -> (i32, i32, i32) {
    %c0_i32 = arith.constant 0 : i32
    %c0_i32_0 = arith.constant 0 : i32
    %c0_i32_1 = arith.constant 0 : i32
    return %arg0, %c0_i32, %c0_i32_0 : i32, i32, i32
  }
  func.func @transform_7(%arg0: i32) -> (i32, i32, i32) {
    %c0_i32 = arith.constant 0 : i32
    %c0_i32_0 = arith.constant 0 : i32
    %c0_i32_1 = arith.constant 0 : i32
    return %arg0, %c0_i32, %c0_i32_0 : i32, i32, i32
  }
}

</mosaic_0001>

<bundles_post_ra>
// kernel: tpu_custom_call.1
= control target key start
LH: loop header
LB: loop body
LE: loop exit
PB: predicated region body
PF: predicated region fallthrough
CT: control target
= control target key end

     0   :  { %12 = vsyncpa [#allocation3], 0  ;;  %s1406_s0 = inlined_call_operand.vmem [shape: f32[2,4,128], index: 0, kind: input, shape index: {}]   ;;  %s1407_s1 = inlined_call_operand.vmem [shape: f32[2,1,128], index: 1, kind: input, shape index: {}]   ;;  %s1408_s2 = inlined_call_operand.vmem [shape: f32[3,16,4], index: 2, kind: input, shape index: {}]   ;;  %s1409_s3 = inlined_call_operand.vmem [shape: f32[16,1], index: 3, kind: input, shape index: {}]   ;;  %s1410_s4 = inlined_call_operand.vmem [shape: f32[16,16], index: 4, kind: input, shape index: {}]   ;;  %s1411_s5 = inlined_call_operand.vmem [shape: f32[2,16,1], index: 5, kind: input, shape index: {}]   ;;  %s1412_s6 = inlined_call_operand.vmem [shape: f32[2,16,1], index: 6, kind: input, shape index: {}]   ;;  %s1413_s7 = inlined_call_operand.hbm [shape: f32[2,16,128], index: 7, kind: output, shape index: {}]  }
   0x1   :  { %14 = vsyncpa [#allocation3 + $0x1], 0  ;;  %s1223_s24 = smov 0   ;;  %s1225_s25 = smov 0  }
   0x2   :  { %s1227_s26 = smov 0   ;;  %s1229_s27 = smov 0  }
   0x3 LB: > { %s1244_s28 = sadd.s32 4294967295, %s1174_s27   ;;  %s970_s29 = sadd.s32 4294967294, %s1174_s27   ;;  %s1174_s27 = sphi %s1229_s27, %s1419_s27   ;;  %s1170_s26 = sphi %s1227_s26, %s1418_s26   ;;  %s1166_s25 = sphi %s1225_s25, %s1417_s25   ;;  %s1162_s24 = sphi %s1223_s24, %s1416_s24  }
   0x4   : > { %s1248_s30 = sadd.s32 1, %s1174_s27   ;;  %s194_s8 = sadd.s32 1, %s1170_s26 }
   0x5   : > { %s191_s9 = ssub.s32 %s1174_s27, %s1248_s30  ;;  %p204_p0 = scmp.ne.s32.totalorder %s1170_s26, %s1166_s25 }
   0x6   : > { %p192_p1 = scmp.eq.s32.totalorder %s191_s9, 0  ;;  %p205_p2 = scmp.eq.s32.totalorder %s1244_s28, 1 }
   0x7   : > { %p210_p3 = scmp.ne.s32.totalorder %s1166_s25, %s1162_s24  ;;  %p211_p4 = scmp.eq.s32.totalorder %s970_s29, 1 }
   0x8   : > { %s1259_s10 = scalar_select %p192_p1, %s1170_s26, %s194_s8  }
   0x9   : > { %p1261_p5 = por %p205_p2, %p204_p0  ;;  %p1265_p6 = por %p211_p4, %p210_p3 }
   0xa   : > { %p973_p7 = scmp.ge.s32.totalorder %s1174_s27, 1  ;;  %p267_p8 = scmp.lt.s32.totalorder %s1174_s27, 3 }
   0xc   : > { %p268_p9 = pnand %p973_p7, %p267_p8 }
   0xd   : > { %p311_p10 = scmp.lt.s32.totalorder (!%p268_p9), %s1244_s28, 1  ;;  %s1176_s13 = smov (!%p268_p9), 1  }
   0xe   : > { %271 = sbr.rel (%p268_p9) target bundleno = 897 (0x381), region = 48  ;;  %s1177_s14 = smov (!%p268_p9), 127  }
  0x13   : > { %v355_v0 = vld [vmem:[%s1408_s2] sm:$0xff]  ;;  %vm357_vm0 = vcmask 31744   ;;  %v981_v1 = vld [vmem:[%s1408_s2 + $0x10] sm:$0xff]  ;;  %s1281_s17 = scalar_select %p311_p10, %s1244_s28, 1  ;;  %vm364_vm1 = vcmask 1043456   ;;  %v982_v5 = vld [vmem:[%s1408_s2 + $0x18] sm:$0xff]  ;;  %v615_v11 = vlaneseq }
  0x14   : > { %1028 = vmatprep.mubr.msk.f32.mxu0 %vm357_vm0, %v355_v0  ;;  %1033 = vmatprep.mubr.msk.f32.mxu1 %vm357_vm0, %v981_v1  ;;  %v356_v7 = vld [vmem:[%s1408_s2 + $0x8] sm:$0xff]  ;;  %v989_v8 = vld [vmem:[%s1408_s2 + $0x20] sm:$0xff]  ;;  %v1178_v19 = vmov 0.0   ;;  %vm646_vm3 = vcmask 130048   ;;  %v1179_v51 = vmov 0  }
  0x15   : > { %s975_s18 = sshll.u32 %s1281_s17, 2  ;;  %s317_s21 = scalar_lea.vmem %s1407_s1, %s1281_s17  ;;  %v990_v10 = vld [vmem:[%s1408_s2 + $0x28] sm:$0xff]  ;;  %v616_v12 = vand.u32 127, %v615_v11  ;;  %v332_v29 = vld [vmem:[%s1410_s4] sm:$0xff]  ;;  %1100 = vset.pattern.permute.xlu1 %v1179_v51  ;;  %1101 = vset.pattern.permute.xlu0 %v1179_v51 }
  0x16   : > { %s314_s29 = scalar_lea.vmem %s1406_s0, %s975_s18  ;;  %v1291_v2 = vld [vmem:[%s317_s21] ss:$0 sm:$0xff]  ;;  %v1332_v30 = vld [vmem:[%s1409_s3 + $0x8] sm:$0xff]  ;;  %s1006_s16 = sshll.u32 %s1281_s17, 4 }
  0x17   : > { %v328_v3 = vld [vmem:[%s314_s29] sm:$0xf]  ;;  %vm617_vm2 = vcmp.lt.s32.totalorder %v616_v12, 16  ;;  %v633_v31 = vmul.f32 16.0, %v1332_v30  ;;  %v637_v32 = vmul.f32 2.0, %v1332_v30  ;;  %v333_v45 = vld [vmem:[%s1410_s4 + $0x8] sm:$0xff]  ;;  %s322_s20 = scalar_lea.vmem %s1411_s5, %s1006_s16  ;;  %s327_s23 = scalar_lea.vmem %s1412_s6, %s1006_s16 }
  0x18   : > { %v344_v4 = vmul.f32 %v1291_v2, %v328_v3  ;;  %v994_v20 = vsel %vm617_vm2, 1.0, %v1178_v19  ;;  %v330_v33 = vld [vmem:[%s1409_s3] sm:$0xff]  ;;  %v335_v62 = vld [vmem:[%s322_s20 + $0x8] sm:$0xff]  ;;  %s308_s17 = sand.u32 1, %s1166_s25  }
  0x19   : > { %v643_v37 = vmul.f32 %v633_v31, %v1332_v30  ;;  %v632_v38 = vmul.f32 16.0, %v330_v33  ;;  %v636_v41 = vmul.f32 2.0, %v330_v33  ;;  %v334_v0 = vld [vmem:[%s322_s20] sm:$0xff]  ;;  %v337_v11 = vld [vmem:[%s327_s23 + $0x8] sm:$0xff]  ;;  %s974_s29 = sshll.u32 %s308_s17, 4  ;;  %s1366_s18 = scalar_lea.sflag [#allocation3], %s308_s17 }
  0x1a   : > { %346 = vrot.lane.b32.xlu0 %v344_v4, %s1176_s13  ;;  %1031 = vmatprep.subr.msk.mxu1 %vm364_vm1, %v344_v4  ;;  %s310_s8 = scalar_lea.vmem [#allocation2], %s974_s29  ;;  %s1008_s13 = sshll.u32 %s1244_s28, 8 }
  0x1b   : > { %1032 = vmatpush3.msk.msra.mxu1 %vm364_vm1, %v344_v4  ;;  %v642_v47 = vmul.f32 %v632_v38, %v330_v33  ;;  %s875_s9 = sshll.u32 %s310_s8, 4  ;;  %s1363_s16 = scalar_lea.hbm %s1413_s7, %s1008_s13  ;;  %s1358_s9 = int_to_ptr.vmem [resolvable:$true] %s875_s9 }
  0x1c   : > { %1034 = vmatmul.mubr.msk.f32.vlgmr.msra.gmra.mxu1 %vm357_vm0, %v982_v5  ;;  %s1114_s19 = scalar_lea.vmem %s1358_s9, 256  ;;  %s1180_s28 = smov [#allocation2]  }
  0x1d   : > { %1045 = vmatprep.mubr.msk.f32.mxu1 %vm646_vm3, %v332_v29  ;;  %p1115_p11 = scmp.ne.s32.totalorder %s1358_s9, %s1114_s19  ;;  %s1118_s20 = sshll.u32 %s1180_s28, 4  ;;  %s1119_s20 = int_to_ptr.vmem [resolvable:$false] %s1118_s20 }
  0x1e   : > { %349 = vrot.lane.b32.xlu0 %v344_v4, %s1177_s14  ;;  %s1120_s21 = scalar_lea.vmem %s1119_s20, 512  ;;  %p1121_p0 = scmp.lt.s32.totalorder %s1358_s9, %s1119_s20 }
  0x1f   : > { %p1116_p12 = pnand %p1115_p11, %p1261_p5  ;;  %p1122_p1 = scmp.lt.s32.totalorder %s1120_s21, %s1114_s19 }
  0x21   : > { %p1117_p13 = pneg %p1116_p12  ;;  %p1123_p2 = por %p1122_p1, %p1121_p0 }
  0x23   : > { %p1124_p3 = pnand %p1123_p2, %p1117_p13 }
  0x8c   : > { %v347_v6 = vpop.permute.xlu0 %346 }
  0x8d   : > { %1026 = vmatprep.subr.msk.mxu0 %vm364_vm1, %v347_v6 }
  0x8e   : > { %1027 = vmatpush3.msk.msra.mxu0 %vm364_vm1, %v347_v6 }
  0x8f   : > { %1029 = vmatmul.mubr.msk.f32.vlgmr.msra.gmra.mxu0 %vm357_vm0, %v356_v7  ;;  %v336_v7 = vld [vmem:[%s327_s23] sm:$0xff] }
  0x90   : > { %v350_v9 = vpop.permute.xlu0 %349  ;;  %1038 = vmatprep.mubr.msk.f32.mxu0 %vm357_vm0, %v989_v8 }
  0x91   : > { %1036 = vmatprep.subr.msk.mxu0 %vm364_vm1, %v350_v9 }
  0x92   : > { %1037 = vmatpush3.msk.msra.mxu0 %vm364_vm1, %v350_v9 }
  0x93   : > { %1039 = vmatmul.mubr.msk.f32.vlgmr.msra.gmra.mxu0 %vm357_vm0, %v990_v10 }
  0x94   : > { %1052 = vmatprep.mubr.msk.f32.mxu0 %vm646_vm3, %v332_v29 }
  0xdc   : > { %v1035_v13 = vpop.f32.mrf.mxu1 }
  0xde   : > { %v517_v16 = vpop.f32.mrf.mxu1 }
 0x14f   : > { %v1030_v14 = vpop.f32.mrf.mxu0 }
 0x150   : > { %v523_v17 = vadd.f32 %v1035_v13, %v1030_v14 }
 0x151   : > { %v434_v15 = vpop.f32.mrf.mxu0 }
 0x152   : > { %v518_v21 = vadd.f32 %v517_v16, %v434_v15 }
 0x153   : > { %v1040_v18 = vpop.f32.mrf.mxu0 }
 0x154   : > { %v1316_v22 = vadd.f32 %v1040_v18, %v523_v17 }
 0x155   : > { %v604_v23 = vpop.f32.mrf.mxu0 }
 0x156   : > { %v1318_v24 = vadd.f32 %v604_v23, %v518_v21  ;;  %v621_v25 = vmul.f32 %v994_v20, %v1316_v22 }
 0x158   : > { %624 = vadd.xlane.f32.xlu1 %v621_v25  ;;  %v627_v26 = vmul.f32 %v621_v25, %v1316_v22  ;;  %v620_v27 = vmul.f32 %v994_v20, %v1318_v24 }
 0x15a   : > { %630 = vadd.xlane.f32.xlu0 %v627_v26  ;;  %v626_v28 = vmul.f32 %v620_v27, %v1318_v24 }
 0x15c   : > { %622 = vadd.xlane.f32.xlu1 %v620_v27 }
 0x160   : > { %628 = vadd.xlane.f32.xlu1 %v626_v28 }
 0x1e1   : > { %v625_v34 = vpop.xlane.xlu1 %624 }
 0x1e2   : > { %v635_v35 = vadd.f32 %v633_v31, %v625_v34  ;;  %v639_v36 = vmul.f32 %v637_v32, %v625_v34 }
 0x1e3   : > { %v631_v39 = vpop.xlane.xlu0 %630 }
 0x1e4   : > { %v641_v40 = vadd.f32 %v639_v36, %v631_v39  ;;  %1041 = vmatprep.subr.mxu1 %v635_v35 }
 0x1e5   : > { %1042 = vmatpush3.msra.mxu1 %v635_v35  ;;  %v623_v42 = vpop.xlane.xlu1 %622 }
 0x1e6   : > { %v645_v43 = vadd.f32 %v643_v37, %v641_v40  ;;  %v634_v44 = vadd.f32 %v632_v38, %v623_v42  ;;  %v638_v46 = vmul.f32 %v636_v41, %v623_v42 }
 0x1e8   : > { %1043 = vmatprep.subr.mxu1 %v634_v44  ;;  %1048 = vmatprep.subr.mxu0 %v645_v43 }
 0x1e9   : > { %1044 = vmatpush3.msra.mxu1 %v634_v44  ;;  %1049 = vmatpush3.msra.mxu0 %v645_v43  ;;  %v629_v48 = vpop.xlane.xlu1 %628 }
 0x1ea   : > { %v640_v49 = vadd.f32 %v638_v46, %v629_v48  ;;  %1046 = vmatmul.mubr.msk.f32.vlgmr.msra.gmra.mxu1 %vm646_vm3, %v333_v45 }
 0x1ec   : > { %v644_v50 = vadd.f32 %v642_v47, %v640_v49 }
 0x1ee   : > { %1050 = vmatprep.subr.mxu0 %v644_v50 }
 0x1ef   : > { %1051 = vmatpush3.msra.mxu0 %v644_v50 }
 0x1f0   : > { %1053 = vmatmul.mubr.msk.f32.vlgmr.msra.gmra.mxu0 %vm646_vm3, %v333_v45 }
 0x2aa   : > { %v1047_v52 = vpop.f32.mrf.mxu1 }
 0x2ab   : > { %v804_v53 = vmul.f32 %v1047_v52, %v1047_v52  ;;  %v814_v8 = vsub.f32 %v1332_v30, %v1047_v52 }
 0x2ac   : > { %v719_v54 = vpop.f32.mrf.mxu1 }
 0x2ad   : > { %v803_v56 = vmul.f32 %v719_v54, %v719_v54  ;;  %v813_v4 = vsub.f32 %v330_v33, %v719_v54 }
 0x2b0   : > { %v1054_v55 = vpop.f32.mrf.mxu0 }
 0x2b1   : > { %v806_v57 = vsub.f32 %v1054_v55, %v804_v53 }
 0x2b2   : > { %v794_v58 = vpop.f32.mrf.mxu0 }
 0x2b3   : > { %v808_v59 = vadd.f32 1e-05, %v806_v57  ;;  %v805_v60 = vsub.f32 %v794_v58, %v803_v56 }
 0x2b5   : > { %1102 = vrsqrt.f32 %v808_v59  ;;  %v807_v61 = vadd.f32 1e-05, %v805_v60 }
 0x2b7   : > { %1104 = vrsqrt.f32 %v807_v61 }
 0x2c2   : > { %v1103_v63 = vpop.eup %1102 }
 0x2c3   : > { %v812_v1 = vmul.f32 %v1103_v63, %v335_v62 }
 0x2c4   : > { %v1105_v3 = vpop.eup %1104 }
 0x2c5   : > { %826 = vperm.xlu1 %1100, %v812_v1   ;;  %v811_v5 = vmul.f32 %v1105_v3, %v334_v0  ;;  %v816_v10 = vmul.f32 %v814_v8, %v812_v1 }
 0x2c7   : > { %v815_v6 = vmul.f32 %v813_v4, %v811_v5  ;;  %v818_v12 = vadd.f32 %v816_v10, %v337_v11 }
 0x2c9   : > { %821 = vperm.xlu1 %1100, %v811_v5   ;;  %v817_v9 = vadd.f32 %v815_v6, %v336_v7 }
 0x2cd   : > { %833 = vperm.xlu1 %1100, %v817_v9  }
 0x2d1   : > { %838 = vperm.xlu1 %1100, %v818_v12  }
 0x340   : > { %v827_v13 = vpop.permute.xlu1 %826 }
 0x341   : > { %v830_v18 = vmul.f32 %v827_v13, %v1316_v22 }
 0x344   : > { %v822_v14 = vpop.permute.xlu1 %821 }
 0x345   : > { %v829_v15 = vmul.f32 %v822_v14, %v1318_v24 }
 0x348   : > { %v834_v16 = vpop.permute.xlu1 %833 }
 0x349   : > { %v841_v17 = vadd.f32 %v834_v16, %v829_v15 }
 0x34b   : > { %v999_v19 = vmul.f32 -1.442695, %v841_v17 }
 0x34c   : > { %v839_v20 = vpop.permute.xlu1 %838 }
 0x34d   : > { %1106 = vpow2.f32 %v999_v19  ;;  %v842_v21 = vadd.f32 %v839_v20, %v830_v18 }
 0x34f   : > { %v1000_v23 = vmul.f32 -1.442695, %v842_v21 }
 0x351   : > { %1108 = vpow2.f32 %v1000_v23 }
 0x35a   : > { %v1107_v25 = vpop.eup %1106 }
 0x35b   : > { %v849_v26 = vadd.f32 1.0, %v1107_v25 }
 0x35d   : > { %1110 = vrcp.f32 %v849_v26 }
 0x35e   : > { %v1109_v27 = vpop.eup %1108 }
 0x35f   : > { %v850_v28 = vadd.f32 1.0, %v1109_v27 }
 0x361   : > { %1112 = vrcp.f32 %v850_v28 }
 0x36a   : > { %v1111_v24 = vpop.eup %1110 }
 0x36b   : > { %v855_v29 = vmul.f32 %v1111_v24, %v841_v17 }
 0x36d   : > { %v857_v22 = vmul.f32 %v1291_v2, %v855_v29 }
 0x36e   : > { %v1113_v30 = vpop.eup %1112 }
 0x36f   : > { %859 = vst [vmem:[%s310_s8] sm:$0xff] %v857_v22  ;;  %v856_v31 = vmul.f32 %v1113_v30, %v842_v21 }
 0x371   : > { %v858_v32 = vmul.f32 %v1291_v2, %v856_v31 }
 0x373   : > { %860 = vst [vmem:[%s310_s8 + $0x8] sm:$0xff] %v858_v32 }
 0x374   : > { %1127 = shalt.err (!%p1124_p3)
}
 0x375   : > { %s1128_s22 = scalar_lea.hbm %s1363_s16, 256  ;;  %s1132_s29 = scalar_lea.hbm %s1413_s7, 512 }
 0x376   : > { %p1129_p4 = scmp.ne.s32.totalorder %s1363_s16, %s1128_s22  ;;  %p1133_p9 = scmp.lt.s32.totalorder %s1363_s16, %s1413_s7 }
 0x377   : > { %p1134_p10 = scmp.lt.s32.totalorder %s1132_s29, %s1128_s22 }
 0x378   : > { %p1130_p7 = pnand %p1129_p4, %p1261_p5 }
 0x379   : > { %p1135_p11 = por %p1134_p10, %p1133_p9 }
 0x37a   : > { %p1131_p8 = pneg %p1130_p7 }
 0x37c   : > { %p1136_p12 = pnand %p1135_p11, %p1131_p8 }
 0x37e   : > { %1139 = shalt.err (!%p1136_p12)
}
 0x37f   : > { %s1181_s14 = smov 128   ;;  %s1182_s15 = smov 8  }
 0x380   : > { %1055 = dma.vmem_to_hbm [thread:$0]  (%p1261_p5), %s1358_s9, 256, %s1363_s16, %s1366_s18, %s1181_s14, %s1181_s14, %s1182_s15  }
 0x381 PF: > { %p1061_p13 = scmp.ge.s32.totalorder %s1174_s27, 2  ;;  %s890_s19 = sand.u32 1, %s1162_s24  }
 0x382   : > { %s891_s28 = scalar_lea.sflag [#allocation3], %s890_s19 }
 0x383   : > { %p1058_p0 = pnand %p1061_p13, %p1265_p6 }
 0x385   : > { %p1059_p1 = pneg %p1058_p0 }
 0x387   : > { %1157 = dma.done.wait (%p1059_p1), %s891_s28, 256  }
 0x388   : > { %1159 = vsyncadd (%p1059_p1), %s891_s28, 4294967040  ;;  %p17_p2 = scmp.ge.s32.totalorder %s1248_s30, 4   ;;  %s1416_s24 = smov %s1166_s25 }
 0x389   : > { %s1417_s25 = smov %s1170_s26  ;;  %s1418_s26 = smov %s1259_s10 }
 0x38a   : > { %s1419_s27 = smov %s1248_s30  ;;  %19 = sbr.rel (!%p17_p2) target bundleno = 3 (0x3), region = 94 }
 0x38f   :  { %896 = vsyncpa [#allocation3], 1 }
 0x390   :  { %898 = vsyncpa [#allocation3 + $0x1], 1 }

</bundles_post_ra>
